<compile_context>
chip_gen: v6e
topology: v6e:2x2x1
jax: 0.10.0
libtpu: 0.0.40
codegen_flags: <defaults>
</compile_context>

<pallas_src>
import functools
import math

import jax
import jax.numpy as jnp
from jax.experimental import pallas as pl
from jax.experimental.pallas import tpu as pltpu

LANES = 128


def _round_up(a, b):
    return ((a + b - 1) // b) * b


def _min_sublanes(itemsize):
    # Native sublane packing: (8,128) f32, (16,128) bf16, (32,128) int8/fp8.
    return {4: 8, 2: 16, 1: 32}.get(itemsize, 8)


def _device_kind():
    try:
        return jax.devices()[0].device_kind.lower()
    except Exception:
        return ""


def _pick_compute_dtype(dtype):
    """bf16 compute only where the VPU is natively bf16 (v6e/v7x)."""
    if dtype == jnp.bfloat16:
        kind = _device_kind()
        if ("v6" in kind) or ("v7" in kind):
            return jnp.bfloat16
    # v5e (and older) have no bf16 VALUs; also keeps f32 numerics for f32 in.
    # TODO(synk): float64 inputs (x64 mode) are computed in f32 — TPUs have no f64 VPU path.
    return jnp.float32


def _dim_semantics():
    kind = _device_kind()
    if "v7" in kind:
        # 2 TensorCores per chip: explicitly shard the row grid across cores.
        return (pltpu.CORE_PARALLEL,)
    return ("parallel",)


def _tropical_kernel(coef_ref, x_ref, o_ref, *, degree, scale, compute_dtype):
    """coef_ref: SMEM (degree+1,) f32, pre-scaled by sqrt(2)/degree.
    x_ref / o_ref: VMEM (tm, 128) tiles (last grid block may be ragged)."""
    x = x_ref[...].astype(compute_dtype)
    # Fold the final positive scale into x once (max is monotone):
    #   out = max_k( k*(scale*x) + scale*c_k )
    xs = x * scale  # python-float multiplier keeps compute_dtype (weak typing)

    # One SMEM read + cast per coefficient, hoisted out of the max chain.
    cs = [coef_ref[k].astype(compute_dtype) for k in range(degree + 1)]

    # k=0 term folded into the first max: scalar cs[0] broadcasts inside
    # jnp.maximum, so no explicit splat / zeros+add full-tile pass.
    acc = jnp.maximum(xs + cs[1], cs[0])
    for k in range(2, degree + 1):
        # Exact small-integer multiply per term: one rounding per term (no
        # running-add drift), same VALU cost as the running-add form.
        acc = jnp.maximum(acc, xs * float(k) + cs[k])

    o_ref[...] = acc.astype(o_ref.dtype)


def tropical_activation(x, coefficients, degree, *, tile_rows=4096):
    """Applies the tropical activation elementwise to `x` (any shape).

    tile_rows: rows per grid block for 4-byte dtypes (scaled up for narrower
    dtypes so the block stays ~2 MiB).  2 MiB blocks amortize the ~0.35 us
    per-grid-step overhead; double-buffered in+out is ~8 MiB of VMEM, safe on
    v5e (16 MiB scoped default), v6e (32 MiB) and v7x (32 MiB / 64 MiB phys).
    """
    if degree < 1:
        raise ValueError("degree must be >= 1 (sqrt(2)/degree scale).")

    orig_shape = x.shape
    orig_dtype = x.dtype
    n = x.size
    scale = math.sqrt(2.0) / float(degree)

    # Pre-scale the (tiny) coefficient vector on the host side (f32).
    scaled_coef = coefficients.astype(jnp.float32) * jnp.float32(scale)

    itemsize = jnp.dtype(orig_dtype).itemsize
    sub = _min_sublanes(itemsize)
    # Keep ~constant block bytes across dtypes; round to native sublane pack.
    tile_rows_eff = _round_up(tile_rows * max(1, 4 // itemsize), sub)

    # Lane-dense slab: rows of 128 lanes.
    rows = pl.cdiv(n, LANES)
    n_lanes = rows * LANES
    flat = x.reshape(-1)
    needs_pad = n_lanes != n
    if needs_pad:
        # Only pad to the next multiple of 128 (<= 127 extra elements); the
        # row dimension is NOT padded to a block multiple.
        flat = jnp.pad(flat, (0, n_lanes - n))
    x2d = flat.reshape(rows, LANES)

    if rows <= tile_rows_eff:
        # Single block equal to the full array dims (always a legal block).
        tm = rows
    else:
        # Multiple of the native sublane pack; Pallas masks the ragged last
        # block, so no padding of the tensor to a block multiple is needed.
        tm = tile_rows_eff
    grid = (pl.cdiv(rows, tm),)

    compute_dtype = _pick_compute_dtype(orig_dtype)
    kern = functools.partial(
        _tropical_kernel, degree=degree, scale=scale, compute_dtype=compute_dtype
    )

    out2d = pl.pallas_call(
        kern,
        out_shape=jax.ShapeDtypeStruct((rows, LANES), orig_dtype),
        grid_spec=pltpu.PrefetchScalarGridSpec(
            num_scalar_prefetch=0,
            grid=grid,
            in_specs=[
                # Whole coefficient vector resident in SMEM for the kernel's
                # lifetime (single up-front copy, no per-step block DMA).
                pl.BlockSpec(memory_space=pltpu.SMEM),
                pl.BlockSpec((tm, LANES), lambda i: (i, 0)),
            ],
            out_specs=pl.BlockSpec((tm, LANES), lambda i: (i, 0)),
        ),
        compiler_params=pltpu.CompilerParams(
            dimension_semantics=_dim_semantics(),
        ),
    )(scaled_coef, x2d)

    out_flat = out2d.reshape(-1)
    if needs_pad:
        out_flat = out_flat[:n]
    return out_flat.reshape(orig_shape)


def tropical_reference(x, coefficients, degree):
    """Pure-JAX reference matching the PyTorch forward exactly."""
    powers = jnp.arange(0, degree + 1, dtype=x.dtype)
    terms = x[..., None] * powers + coefficients.astype(x.dtype)
    return math.sqrt(2.0) / degree * jnp.max(terms, axis=-1)


if __name__ == "__main__":
    degree = 4
    # Deterministic parameter init, matching nn.Parameter(torch.ones(degree+1)).
    coefficients = jnp.ones((degree + 1,), dtype=jnp.float32)

    key = jax.random.PRNGKey(0)

    # Case 1: the common NCHW case (element count divisible by 128 -> no pad).
    x = jax.random.normal(key, (2, 4, 16, 16), dtype=jnp.float32)
    out = tropical_activation(x, coefficients, degree)
    out = jax.block_until_ready(out)
    ref = tropical_reference(x, coefficients, degree)
    assert out.shape == x.shape and out.dtype == x.dtype
    assert jnp.allclose(out, ref, atol=1e-5, rtol=1e-5), "mismatch vs reference (case 1)"

    # Case 2: non-128-divisible element count (exercises the minimal-pad path).
    x2 = jax.random.normal(jax.random.PRNGKey(1), (3, 7, 50), dtype=jnp.float32)
    out2 = tropical_activation(x2, coefficients, degree)
    out2 = jax.block_until_ready(out2)
    ref2 = tropical_reference(x2, coefficients, degree)
    assert out2.shape == x2.shape and out2.dtype == x2.dtype
    assert jnp.allclose(out2, ref2, atol=1e-5, rtol=1e-5), "mismatch vs reference (case 2)"

    print("KERNEL_OK")
</pallas_src>

<mosaic_0001>
module attributes {stable_mosaic.version = 11 : i64} {
  func.func @_tropical_kernel(%arg0: i32, %arg1: memref<5xf32, #tpu.memory_space<smem>>, %arg2: memref<16x128xf32, #tpu.memory_space<vmem>>, %arg3: memref<16x128xf32, #tpu.memory_space<vmem>>) attributes {dimension_semantics = [#tpu.dimension_semantics<parallel>], iteration_bounds = array<i64: 1>, scalar_prefetch = 0 : i64, scratch_operands = 0 : i64, tpu.core_type = #tpu.core_type<tc>, window_params = [{transform_indices = @transform_0, window_bounds = array<i64: 5>}, {transform_indices = @transform_1, window_bounds = array<i64: 16, 128>}, {transform_indices = @transform_2, window_bounds = array<i64: 16, 128>}]} {
    %c0 = arith.constant 0 : index
    %c0_0 = arith.constant 0 : index
    %0 = vector.load %arg2[%c0, %c0_0] : memref<16x128xf32, #tpu.memory_space<vmem>>, vector<16x128xf32>
    %cst = arith.constant 0.353553385 : f32
    %1 = vector.broadcast %cst : f32 to vector<16x128xf32>
    %2 = arith.mulf %0, %1 : vector<16x128xf32>
    %c0_1 = arith.constant 0 : index
    %3 = memref.load %arg1[%c0_1] : memref<5xf32, #tpu.memory_space<smem>>
    %c1 = arith.constant 1 : index
    %4 = memref.load %arg1[%c1] : memref<5xf32, #tpu.memory_space<smem>>
    %c2 = arith.constant 2 : index
    %5 = memref.load %arg1[%c2] : memref<5xf32, #tpu.memory_space<smem>>
    %c3 = arith.constant 3 : index
    %6 = memref.load %arg1[%c3] : memref<5xf32, #tpu.memory_space<smem>>
    %c4 = arith.constant 4 : index
    %7 = memref.load %arg1[%c4] : memref<5xf32, #tpu.memory_space<smem>>
    %8 = vector.broadcast %4 : f32 to vector<16x128xf32>
    %9 = arith.addf %2, %8 : vector<16x128xf32>
    %10 = vector.broadcast %3 : f32 to vector<16x128xf32>
    %11 = arith.maximumf %9, %10 : vector<16x128xf32>
    %cst_2 = arith.constant 2.000000e+00 : f32
    %12 = vector.broadcast %cst_2 : f32 to vector<16x128xf32>
    %13 = arith.mulf %2, %12 : vector<16x128xf32>
    %14 = vector.broadcast %5 : f32 to vector<16x128xf32>
    %15 = arith.addf %13, %14 : vector<16x128xf32>
    %16 = arith.maximumf %11, %15 : vector<16x128xf32>
    %cst_3 = arith.constant 3.000000e+00 : f32
    %17 = vector.broadcast %cst_3 : f32 to vector<16x128xf32>
    %18 = arith.mulf %2, %17 : vector<16x128xf32>
    %19 = vector.broadcast %6 : f32 to vector<16x128xf32>
    %20 = arith.addf %18, %19 : vector<16x128xf32>
    %21 = arith.maximumf %16, %20 : vector<16x128xf32>
    %cst_4 = arith.constant 4.000000e+00 : f32
    %22 = vector.broadcast %cst_4 : f32 to vector<16x128xf32>
    %23 = arith.mulf %2, %22 : vector<16x128xf32>
    %24 = vector.broadcast %7 : f32 to vector<16x128xf32>
    %25 = arith.addf %23, %24 : vector<16x128xf32>
    %26 = arith.maximumf %21, %25 : vector<16x128xf32>
    %c0_5 = arith.constant 0 : index
    %c0_6 = arith.constant 0 : index
    %27 = vector.load %arg3[%c0_5, %c0_6] : memref<16x128xf32, #tpu.memory_space<vmem>>, vector<16x128xf32>
    tpu.vector_store %arg3[%c0_5, %c0_6], %26 {strides = array<i32>} : memref<16x128xf32, #tpu.memory_space<vmem>>, vector<16x128xf32>,
    return
  }
  func.func @transform_0(%arg0: i32) -> i32 {
    %c0_i32 = arith.constant 0 : i32
    %c0_i32_0 = arith.constant 0 : i32
    return %c0_i32 : i32
  }
  func.func @transform_1(%arg0: i32) -> (i32, i32) {
    %c0_i32 = arith.constant 0 : i32
    %c0_i32_0 = arith.constant 0 : i32
    return %arg0, %c0_i32 : i32, i32
  }
  func.func @transform_2(%arg0: i32) -> (i32, i32) {
    %c0_i32 = arith.constant 0 : i32
    %c0_i32_0 = arith.constant 0 : i32
    return %arg0, %c0_i32 : i32, i32
  }
}

</mosaic_0001>

<bundles_post_ra>
// kernel: tpu_custom_call.1
= control target key start
LH: loop header
LB: loop body
LE: loop exit
PB: predicated region body
PF: predicated region fallthrough
CT: control target
= control target key end

     0   :  { %7 = vsyncpa [#allocation5], 0  ;;  %s191_s0 = inlined_call_operand.hbm [shape: f32[5], index: 0, kind: input, shape index: {}]   ;;  %s192_s1 = inlined_call_operand.hbm [shape: f32[16,128], index: 1, kind: input, shape index: {}]   ;;  %s193_s2 = inlined_call_operand.hbm [shape: f32[16,128], index: 2, kind: output, shape index: {}]  }
   0x1   :  { %8 = vsyncpa [#allocation3], 0 }
   0x2   :  { %9 = vsyncpa [#allocation4], 0  ;;  %s156_s9 = smov [#allocation2]   ;;  %s157_s12 = smov [#allocation6]  }
   0x3   :  { %17 = dma.hbm_to_smem %s191_s0, 16, %s156_s9, [#allocation5]  }
   0x4   :  { %s23_s13 = sshll.u32 %s157_s12, 4  ;;  %s24_s13 = int_to_ptr.vmem [resolvable:$true] %s23_s13 }
   0x5   :  { %s118_s14 = scalar_lea.vmem %s24_s13, 256  ;;  %p123_p1 = scmp.lt.s32.totalorder %s24_s13, %s24_s13 }
   0x6   :  { %p119_p0 = scmp.ne.s32.totalorder %s24_s13, %s118_s14  ;;  %p124_p2 = scmp.lt.s32.totalorder %s118_s14, %s118_s14 }
   0x8   :  { %p125_p3 = por %p124_p2, %p123_p1 }
   0xa   :  { %p126_p4 = pnand %p125_p3, %p119_p0 }
   0xc   :  { %129 = shalt.err (!%p126_p4)
}
   0xd   :  { %s158_s15 = smov 128   ;;  %s159_s16 = smov 8  }
   0xe   :  { %29 = dma.hbm_to_vmem [thread:$0]  %s192_s1, 256, %s24_s13, [#allocation3], %s158_s15, %s158_s15, %s159_s16  }
   0xf   :  { %150 = dma.done.wait [#allocation5], 16  }
  0x10   :  { %151 = vsyncadd [#allocation5], 4294967280 }
  0x11   :  { %152 = dma.done.wait [#allocation3], 256  }
  0x12   :  { %153 = vsyncadd [#allocation3], 4294967040 }
  0x13   :  { %36 = sfence }
  0x14   :  { %v37_v0 = vld [vmem:[#allocation6] sm:$0xff]  ;;  %s41_s0 = sld [smem:[#allocation2]]  ;;  %v38_v1 = vld [vmem:[#allocation6 + $0x8] sm:$0xff]  ;;  %s160_s1 = smov [#allocation7]  }
  0x15   :  { %v39_v2 = vmul.f32 0.35355338, %v37_v0  ;;  %s93_s19 = sld [smem:[#allocation2 + $0x1]]  ;;  %v40_v3 = vmul.f32 0.35355338, %v38_v1  ;;  %s80_s23 = sshll.u32 %s160_s1, 4  ;;  %s81_s23 = int_to_ptr.vmem [resolvable:$true] %s80_s23 }
  0x16   :  { %s94_s20 = sld [smem:[#allocation2 + $0x2]]  ;;  %s130_s24 = scalar_lea.vmem %s81_s23, 256 }
  0x17   :  { %s95_s21 = sld [smem:[#allocation2 + $0x3]]  ;;  %v52_v4 = vmul.f32 2.0, %v39_v2  ;;  %v53_v5 = vmul.f32 2.0, %v40_v3  ;;  %v59_v6 = vmul.f32 3.0, %v39_v2  ;;  %v66_v9 = vmul.f32 4.0, %v39_v2  ;;  %p131_p5 = scmp.ne.s32.totalorder %s81_s23, %s130_s24 }
  0x18   :  { %s96_s22 = sld [smem:[#allocation2 + $0x4]]  ;;  %v60_v10 = vmul.f32 3.0, %v40_v3  ;;  %v67_v14 = vmul.f32 4.0, %v40_v3  ;;  %p135_p6 = scmp.lt.s32.totalorder %s81_s23, %s81_s23 }
  0x19   :  { %p136_p7 = scmp.lt.s32.totalorder %s130_s24, %s130_s24 }
  0x1a   :  { %v49_v8 = vstv %s41_s0 }
  0x1b   :  { %v46_v7 = vstv %s93_s19  ;;  %p137_p8 = por %p136_p7, %p135_p6 }
  0x1c   :  { %v47_v11 = vadd.f32 %v46_v7, %v39_v2  ;;  %v54_v12 = vstv %s94_s20  ;;  %v48_v13 = vadd.f32 %v46_v7, %v40_v3 }
  0x1d   :  { %v55_v15 = vadd.f32 %v54_v12, %v52_v4  ;;  %v61_v16 = vstv %s95_s21  ;;  %v56_v17 = vadd.f32 %v54_v12, %v53_v5  ;;  %p138_p9 = pnand %p137_p8, %p131_p5 }
  0x1e   :  { %v50_v18 = vmax.f32 %v47_v11, %v49_v8  ;;  %v62_v19 = vadd.f32 %v61_v16, %v59_v6  ;;  %v68_v20 = vstv %s96_s22  ;;  %v51_v21 = vmax.f32 %v48_v13, %v49_v8 }
  0x1f   :  { %v63_v22 = vadd.f32 %v61_v16, %v60_v10  ;;  %v69_v24 = vadd.f32 %v68_v20, %v66_v9  ;;  %v70_v26 = vadd.f32 %v68_v20, %v67_v14 }
  0x20   :  { %v57_v23 = vmax.f32 %v50_v18, %v55_v15  ;;  %v58_v25 = vmax.f32 %v51_v21, %v56_v17 }
  0x22   :  { %v64_v27 = vmax.f32 %v57_v23, %v62_v19  ;;  %v65_v28 = vmax.f32 %v58_v25, %v63_v22 }
  0x24   :  { %v71_v29 = vmax.f32 %v64_v27, %v69_v24  ;;  %v72_v30 = vmax.f32 %v65_v28, %v70_v26 }
  0x26   :  { %73 = vst [vmem:[#allocation7] sm:$0xff] %v71_v29  ;;  %74 = vst [vmem:[#allocation7 + $0x8] sm:$0xff] %v72_v30 }
  0x27   :  { %141 = shalt.err (!%p138_p9)
}
  0x28   :  { %86 = dma.vmem_to_hbm [thread:$0]  %s81_s23, 256, %s193_s2, [#allocation4], %s158_s15, %s158_s15, %s159_s16  }
  0x29   :  { %154 = dma.done.wait [#allocation4], 256  }
  0x2a   :  { %155 = vsyncadd [#allocation4], 4294967040 }
  0x2b   :  { %90 = vsyncpa [#allocation3], 1 }
  0x2c   :  { %91 = vsyncpa [#allocation4], 1 }
  0x2d   :  { %92 = vsyncpa [#allocation5], 1 }

</bundles_post_ra>
